<compile_context>
chip_gen: v6e
topology: v6e:2x2x1
jax: 0.10.0
libtpu: 0.0.40
codegen_flags: <defaults>
</compile_context>

<pallas_src>
import math

import jax
import jax.numpy as jnp
from jax.experimental import pallas as pl
from jax.experimental.pallas import tpu as pltpu

# ---- model hyper-parameters (small, consistent with ModelArgs) -------------
BSZ = 2
SEQLEN = 8
DIM = 32
N_HEADS = 4
HEAD_DIM = DIM // N_HEADS      # 8
BS = BSZ * SEQLEN              # 16

# ---- constant-slab row layout (single f32 input, one DMA) ------------------
_ROW_WPROJ = 0                 # rows [0, DIM)        : fused proj weights (DIM, 5*DIM)
_ROW_WO = DIM                  # rows [DIM, 2*DIM)    : Wo (DIM, DIM), lane-padded
_ROW_COS = 2 * DIM             # rows [.., ..+BS)     : cos tiled per head & batch
_ROW_SIN = 2 * DIM + BS        # rows [.., ..+BS)     : sin tiled per head & batch
_ROW_MASK = 2 * DIM + 2 * BS   # rows [.., ..+BS)     : (BS,BS) additive mask
_SLAB_ROWS = 2 * DIM + 3 * BS  # 112
_SLAB_LANES = 5 * DIM          # 160


# ---------------------------------------------------------------------------
# Pallas kernel: full attention forward for the whole batch (single call)
# ---------------------------------------------------------------------------
def attention_kernel(x_ref, slab_ref, o_ref):
    d = DIM
    bs = BS

    # --- fused projection [q*s | k | rot(q)*s | rot(k) | v] : one MXU matmul,
    #     bf16 operands / f32 accumulation.
    x = x_ref[...]                                                    # (BS, D) bf16
    w_proj = slab_ref[_ROW_WPROJ:_ROW_WPROJ + d, :].astype(jnp.bfloat16)   # (D, 5D)
    proj = jnp.dot(x, w_proj, preferred_element_type=jnp.float32)     # (BS, 5D) f32

    cos = slab_ref[_ROW_COS:_ROW_COS + bs, 0:d]                       # (BS, D) f32
    sin = slab_ref[_ROW_SIN:_ROW_SIN + bs, 0:d]                       # (BS, D) f32
    msk = slab_ref[_ROW_MASK:_ROW_MASK + bs, 0:bs]                    # (BS, BS) f32

    # RoPE: rotate-half folded into the weights; softmax scale folded into the
    # Wq / Wq@R columns -> just two f32 FMAs, no lane roll/concat, no rescale.
    q = proj[:, 0 * d:1 * d] * cos + proj[:, 2 * d:3 * d] * sin
    k = proj[:, 1 * d:2 * d] * cos + proj[:, 3 * d:4 * d] * sin
    v = proj[:, 4 * d:5 * d]                                          # lane-128 aligned

    qb = q.astype(jnp.bfloat16)
    kb = k.astype(jnp.bfloat16)
    vb = v.astype(jnp.bfloat16)
    wo = slab_ref[_ROW_WO:_ROW_WO + d, 0:d]                           # (D, D) f32

    # Per-head attention: pure 2-D matmuls over all BS = B*S positions; the
    # block-diagonal additive mask kills cross-batch pairs, so neither batch
    # nor head ever needs a transpose / reshape.  Head merge is folded into
    # the output projection (out += o_h @ Wo[h]).  Static unroll (4 heads).
    out = jnp.zeros((bs, d), jnp.float32)
    for h in range(N_HEADS):
        lo, hi = h * HEAD_DIM, (h + 1) * HEAD_DIM
        q_h = qb[:, lo:hi]                                            # (BS, hd)
        k_h = kb[:, lo:hi]
        v_h = vb[:, lo:hi]

        # scores = q_h @ k_h^T  (scale already folded into q)
        s = jax.lax.dot_general(q_h, k_h, (((1,), (1,)), ((), ())),
                                preferred_element_type=jnp.float32)   # (BS, BS)
        s = s + msk
        s = s - jnp.max(s, axis=-1, keepdims=True)                    # f32 softmax
        e = jnp.exp(s)
        p = e * pl.reciprocal(jnp.sum(e, axis=-1, keepdims=True), approx=True)

        o_h = jnp.dot(p.astype(jnp.bfloat16), v_h,
                      preferred_element_type=jnp.float32)             # (BS, hd)
        wo_h = wo[lo:hi, :].astype(jnp.bfloat16)                      # (hd, D)
        out = out + jnp.dot(o_h.astype(jnp.bfloat16), wo_h,
                            preferred_element_type=jnp.float32)

    # Output last dim 32 (<128) -> masked store; negligible at this toy size.
    o_ref[...] = out.astype(o_ref.dtype)


# ---------------------------------------------------------------------------
# Wrapper (all one-time prep: weight fusion, scale fold, mask build, slab pack)
# ---------------------------------------------------------------------------
def _rotate_half_matrix(n_heads, head_dim, dtype):
    """(D, D) signed permutation R such that t @ R == rotate_half per head (exact)."""
    half = head_dim // 2
    idx = jnp.arange(half)
    r = jnp.zeros((head_dim, head_dim), dtype=dtype)
    r = r.at[half + idx, idx].set(-1.0)    # out[:, :half] = -t[:, half:]
    r = r.at[idx, half + idx].set(1.0)     # out[:, half:] =  t[:, :half]
    return jnp.kron(jnp.eye(n_heads, dtype=dtype), r)   # block-diag over heads


def _pad_lanes(a, width):
    return jnp.pad(a, ((0, 0), (0, width - a.shape[1])))


def attention_forward(x, cos, sin, mask, wq_t, wk_t, wv_t, wo_t):
    """x: (B,S,D); cos/sin: (S,hd); mask: (S,S); w*_t: (D,D) pre-transposed (x@W)."""
    B, S, D = x.shape
    H, hd = N_HEADS, HEAD_DIM
    bs = B * S
    f32 = jnp.float32

    # Fold rotate-half permutation AND the softmax scale into the weights.
    scale = 1.0 / math.sqrt(hd)
    R = _rotate_half_matrix(H, hd, f32)
    w_fused = jnp.concatenate(
        [wq_t * scale, wk_t, (wq_t @ R) * scale, wk_t @ R, wv_t], axis=1)  # (D, 5D)

    # cos/sin tiled per head and per batch -> (BS, D)
    cos_bs = jnp.tile(jnp.tile(cos, (1, H)), (B, 1)).astype(f32)
    sin_bs = jnp.tile(jnp.tile(sin, (1, H)), (B, 1)).astype(f32)

    # Full (BS, BS) additive mask: user mask inside each batch block, -1e9
    # across batches (enables transpose-free 2-D score matmuls in the kernel).
    rows = jnp.arange(bs)
    same_batch = (rows[:, None] // S) == (rows[None, :] // S)
    full_mask = jnp.where(same_batch, jnp.tile(mask, (B, B)), -1e9).astype(f32)

    # Single f32 constant slab -> one HBM->VMEM DMA for all weights/rope/mask.
    slab = jnp.concatenate([
        w_fused.astype(f32),                       # rows [0, D)
        _pad_lanes(wo_t.astype(f32), 5 * D),       # rows [D, 2D)
        _pad_lanes(cos_bs, 5 * D),                 # rows [2D, 2D+BS)
        _pad_lanes(sin_bs, 5 * D),                 # rows [2D+BS, 2D+2BS)
        _pad_lanes(full_mask, 5 * D),              # rows [2D+2BS, 2D+3BS)
    ], axis=0)
    assert slab.shape == (_SLAB_ROWS, _SLAB_LANES)

    # bf16 activation operand for the MXU (f32 accumulation in-kernel).
    x_bf = x.reshape(bs, D).astype(jnp.bfloat16)

    vmem = pl.BlockSpec(memory_space=pltpu.MemorySpace.VMEM)
    out = pl.pallas_call(
        attention_kernel,
        out_shape=jax.ShapeDtypeStruct((bs, D), x.dtype),
        in_specs=[vmem, vmem],
        out_specs=vmem,
    )(x_bf, slab)
    return out.reshape(B, S, D)


# ---------------------------------------------------------------------------
# Pure-JAX f32 reference (mirrors the PyTorch forward exactly)
# ---------------------------------------------------------------------------
def rotate_half(x):
    half = x.shape[-1] // 2
    x1, x2 = x[..., :half], x[..., half:]
    return jnp.concatenate([-x2, x1], axis=-1)


def reference_forward(x, cos, sin, mask, wq_t, wk_t, wv_t, wo_t):
    B, S, D = x.shape
    xq = (x @ wq_t).reshape(B, S, N_HEADS, HEAD_DIM)
    xk = (x @ wk_t).reshape(B, S, N_HEADS, HEAD_DIM)
    xv = (x @ wv_t).reshape(B, S, N_HEADS, HEAD_DIM)
    c = cos[None, :, None, :]
    s = sin[None, :, None, :]
    xq = xq * c + rotate_half(xq) * s
    xk = xk * c + rotate_half(xk) * s
    xq = xq.transpose(0, 2, 1, 3)
    xk = xk.transpose(0, 2, 1, 3)
    xv = xv.transpose(0, 2, 1, 3)
    scores = (xq @ xk.transpose(0, 1, 3, 2)) / math.sqrt(HEAD_DIM)
    scores = scores + mask[None, None]
    scores = jax.nn.softmax(scores.astype(jnp.float32), axis=-1).astype(xq.dtype)
    out = scores @ xv
    out = out.transpose(0, 2, 1, 3).reshape(B, S, -1)
    return out @ wo_t


# ---------------------------------------------------------------------------
if __name__ == "__main__":
    key = jax.random.PRNGKey(0)
    k_x, k_q, k_k, k_v, k_o = jax.random.split(key, 5)

    x = jax.random.normal(k_x, (BSZ, SEQLEN, DIM), dtype=jnp.float32)

    # Deterministic weights; stored as (in_dim, out_dim) == W.T of nn.Linear
    wq_t = 0.02 * jax.random.normal(k_q, (DIM, DIM), dtype=jnp.float32)
    wk_t = 0.02 * jax.random.normal(k_k, (DIM, DIM), dtype=jnp.float32)
    wv_t = 0.02 * jax.random.normal(k_v, (DIM, DIM), dtype=jnp.float32)
    wo_t = 0.02 * jax.random.normal(k_o, (DIM, DIM), dtype=jnp.float32)

    # Rotary embeddings: (S, head_dim)
    inv_freq = 1.0 / (10000.0 ** (jnp.arange(0, HEAD_DIM, 2, dtype=jnp.float32) / HEAD_DIM))
    pos = jnp.arange(SEQLEN, dtype=jnp.float32)
    freqs = pos[:, None] * inv_freq[None, :]            # (S, hd/2)
    emb = jnp.concatenate([freqs, freqs], axis=-1)      # (S, hd)
    cos = jnp.cos(emb)
    sin = jnp.sin(emb)

    # Additive causal mask (0 on/below diagonal, large negative above)
    mask = jnp.where(
        jnp.arange(SEQLEN)[:, None] >= jnp.arange(SEQLEN)[None, :],
        0.0, -1e9).astype(jnp.float32)

    out = attention_forward(x, cos, sin, mask, wq_t, wk_t, wv_t, wo_t)
    out = jax.block_until_ready(out)

    ref = reference_forward(x, cos, sin, mask, wq_t, wk_t, wv_t, wo_t)
    assert out.shape == (BSZ, SEQLEN, DIM)
    # Tolerance relaxed for bf16 MXU operands + approx (EUP) softmax reciprocal
    # (measured/expected error ~1e-3 abs; this leaves ~10x margin).
    assert jnp.allclose(out, ref, atol=1e-2, rtol=1e-2), "mismatch vs reference"

    print("KERNEL_OK")
</pallas_src>

<mosaic_0001>
module attributes {stable_mosaic.version = 11 : i64} {
  func.func @attention_kernel(%arg0: memref<16x32xbf16, #tpu.memory_space<vmem>>, %arg1: memref<112x160xf32, #tpu.memory_space<vmem>>, %arg2: memref<16x32xf32, #tpu.memory_space<vmem>>) attributes {dimension_semantics = [], scalar_prefetch = 0 : i64, scratch_operands = 0 : i64, tpu.core_type = #tpu.core_type<tc>} {
    %c0 = arith.constant 0 : index
    %c0_0 = arith.constant 0 : index
    %0 = vector.load %arg0[%c0, %c0_0] : memref<16x32xbf16, #tpu.memory_space<vmem>>, vector<16x32xbf16>
    %c0_1 = arith.constant 0 : index
    %c0_2 = arith.constant 0 : index
    %1 = vector.load %arg1[%c0_1, %c0_2] : memref<112x160xf32, #tpu.memory_space<vmem>>, vector<32x160xf32>
    %2 = arith.truncf %1 : vector<32x160xf32> to vector<32x160xbf16>
    %cst = arith.constant dense<0.000000e+00> : vector<16x160xf32>
    %3 = tpu.matmul %0, %2, %cst {dimension_numbers = #tpu.dot_dimension_numbers<[1], [0], [0], [1], [0, 0, 1, 1], [], []>} : vector<16x32xbf16>, vector<32x160xbf16>, vector<16x160xf32> -> vector<16x160xf32>
    %c64 = arith.constant 64 : index
    %c0_3 = arith.constant 0 : index
    %4 = vector.load %arg1[%c64, %c0_3] : memref<112x160xf32, #tpu.memory_space<vmem>>, vector<16x32xf32>
    %c80 = arith.constant 80 : index
    %c0_4 = arith.constant 0 : index
    %5 = vector.load %arg1[%c80, %c0_4] : memref<112x160xf32, #tpu.memory_space<vmem>>, vector<16x32xf32>
    %c96 = arith.constant 96 : index
    %c0_5 = arith.constant 0 : index
    %6 = vector.load %arg1[%c96, %c0_5] : memref<112x160xf32, #tpu.memory_space<vmem>>, vector<16x16xf32>
    %7 = vector.extract_strided_slice %3 {offsets = [0, 0], sizes = [16, 32], strides = [1, 1]} : vector<16x160xf32> to vector<16x32xf32>
    %8 = arith.mulf %7, %4 : vector<16x32xf32>
    %9 = vector.extract_strided_slice %3 {offsets = [0, 64], sizes = [16, 32], strides = [1, 1]} : vector<16x160xf32> to vector<16x32xf32>
    %10 = arith.mulf %9, %5 : vector<16x32xf32>
    %11 = arith.addf %8, %10 : vector<16x32xf32>
    %12 = vector.extract_strided_slice %3 {offsets = [0, 32], sizes = [16, 32], strides = [1, 1]} : vector<16x160xf32> to vector<16x32xf32>
    %13 = arith.mulf %12, %4 : vector<16x32xf32>
    %14 = vector.extract_strided_slice %3 {offsets = [0, 96], sizes = [16, 32], strides = [1, 1]} : vector<16x160xf32> to vector<16x32xf32>
    %15 = arith.mulf %14, %5 : vector<16x32xf32>
    %16 = arith.addf %13, %15 : vector<16x32xf32>
    %17 = vector.extract_strided_slice %3 {offsets = [0, 128], sizes = [16, 32], strides = [1, 1]} : vector<16x160xf32> to vector<16x32xf32>
    %18 = arith.truncf %11 : vector<16x32xf32> to vector<16x32xbf16>
    %19 = arith.truncf %16 : vector<16x32xf32> to vector<16x32xbf16>
    %20 = arith.truncf %17 : vector<16x32xf32> to vector<16x32xbf16>
    %c32 = arith.constant 32 : index
    %c0_6 = arith.constant 0 : index
    %21 = vector.load %arg1[%c32, %c0_6] : memref<112x160xf32, #tpu.memory_space<vmem>>, vector<32x32xf32>
    %cst_7 = arith.constant 0.000000e+00 : f32
    %22 = vector.broadcast %cst_7 : f32 to vector<16x32xf32>
    %23 = vector.extract_strided_slice %18 {offsets = [0, 0], sizes = [16, 8], strides = [1, 1]} : vector<16x32xbf16> to vector<16x8xbf16>
    %24 = vector.extract_strided_slice %19 {offsets = [0, 0], sizes = [16, 8], strides = [1, 1]} : vector<16x32xbf16> to vector<16x8xbf16>
    %25 = vector.extract_strided_slice %20 {offsets = [0, 0], sizes = [16, 8], strides = [1, 1]} : vector<16x32xbf16> to vector<16x8xbf16>
    %cst_8 = arith.constant dense<0.000000e+00> : vector<16x16xf32>
    %26 = tpu.matmul %23, %24, %cst_8 {dimension_numbers = #tpu.dot_dimension_numbers<[1], [1], [0], [0], [0, 0, 1, 0], [], []>} : vector<16x8xbf16>, vector<16x8xbf16>, vector<16x16xf32> -> vector<16x16xf32>
    %27 = arith.addf %26, %6 : vector<16x16xf32>
    %cst_9 = arith.constant dense<0xFF800000> : vector<16xf32>
    %28 = vector.multi_reduction <maximumf>, %27, %cst_9 [1] : vector<16x16xf32> to vector<16xf32>
    %29 = vector.shape_cast %28 : vector<16xf32> to vector<16x1xf32>
    %30 = vector.broadcast %29 : vector<16x1xf32> to vector<16x16xf32>
    %31 = arith.subf %27, %30 : vector<16x16xf32>
    %32 = math.exp %31 : vector<16x16xf32>
    %cst_10 = arith.constant dense<0.000000e+00> : vector<16xf32>
    %33 = vector.multi_reduction <add>, %32, %cst_10 [1] : vector<16x16xf32> to vector<16xf32>
    %34 = vector.shape_cast %33 : vector<16xf32> to vector<16x1xf32>
    %35 = tpu.reciprocal %34 {approx = true} : vector<16x1xf32> -> vector<16x1xf32>
    %36 = vector.broadcast %35 : vector<16x1xf32> to vector<16x16xf32>
    %37 = arith.mulf %32, %36 : vector<16x16xf32>
    %38 = arith.truncf %37 : vector<16x16xf32> to vector<16x16xbf16>
    %cst_11 = arith.constant dense<0.000000e+00> : vector<16x8xf32>
    %39 = tpu.matmul %38, %25, %cst_11 {dimension_numbers = #tpu.dot_dimension_numbers<[1], [0], [0], [1], [0, 0, 1, 1], [], []>} : vector<16x16xbf16>, vector<16x8xbf16>, vector<16x8xf32> -> vector<16x8xf32>
    %40 = vector.extract_strided_slice %21 {offsets = [0, 0], sizes = [8, 32], strides = [1, 1]} : vector<32x32xf32> to vector<8x32xf32>
    %41 = arith.truncf %40 : vector<8x32xf32> to vector<8x32xbf16>
    %42 = arith.truncf %39 : vector<16x8xf32> to vector<16x8xbf16>
    %cst_12 = arith.constant dense<0.000000e+00> : vector<16x32xf32>
    %43 = tpu.matmul %42, %41, %cst_12 {dimension_numbers = #tpu.dot_dimension_numbers<[1], [0], [0], [1], [0, 0, 1, 1], [], []>} : vector<16x8xbf16>, vector<8x32xbf16>, vector<16x32xf32> -> vector<16x32xf32>
    %44 = arith.addf %22, %43 : vector<16x32xf32>
    %45 = vector.extract_strided_slice %18 {offsets = [0, 8], sizes = [16, 8], strides = [1, 1]} : vector<16x32xbf16> to vector<16x8xbf16>
    %46 = vector.extract_strided_slice %19 {offsets = [0, 8], sizes = [16, 8], strides = [1, 1]} : vector<16x32xbf16> to vector<16x8xbf16>
    %47 = vector.extract_strided_slice %20 {offsets = [0, 8], sizes = [16, 8], strides = [1, 1]} : vector<16x32xbf16> to vector<16x8xbf16>
    %cst_13 = arith.constant dense<0.000000e+00> : vector<16x16xf32>
    %48 = tpu.matmul %45, %46, %cst_13 {dimension_numbers = #tpu.dot_dimension_numbers<[1], [1], [0], [0], [0, 0, 1, 0], [], []>} : vector<16x8xbf16>, vector<16x8xbf16>, vector<16x16xf32> -> vector<16x16xf32>
    %49 = arith.addf %48, %6 : vector<16x16xf32>
    %cst_14 = arith.constant dense<0xFF800000> : vector<16xf32>
    %50 = vector.multi_reduction <maximumf>, %49, %cst_14 [1] : vector<16x16xf32> to vector<16xf32>
    %51 = vector.shape_cast %50 : vector<16xf32> to vector<16x1xf32>
    %52 = vector.broadcast %51 : vector<16x1xf32> to vector<16x16xf32>
    %53 = arith.subf %49, %52 : vector<16x16xf32>
    %54 = math.exp %53 : vector<16x16xf32>
    %cst_15 = arith.constant dense<0.000000e+00> : vector<16xf32>
    %55 = vector.multi_reduction <add>, %54, %cst_15 [1] : vector<16x16xf32> to vector<16xf32>
    %56 = vector.shape_cast %55 : vector<16xf32> to vector<16x1xf32>
    %57 = tpu.reciprocal %56 {approx = true} : vector<16x1xf32> -> vector<16x1xf32>
    %58 = vector.broadcast %57 : vector<16x1xf32> to vector<16x16xf32>
    %59 = arith.mulf %54, %58 : vector<16x16xf32>
    %60 = arith.truncf %59 : vector<16x16xf32> to vector<16x16xbf16>
    %cst_16 = arith.constant dense<0.000000e+00> : vector<16x8xf32>
    %61 = tpu.matmul %60, %47, %cst_16 {dimension_numbers = #tpu.dot_dimension_numbers<[1], [0], [0], [1], [0, 0, 1, 1], [], []>} : vector<16x16xbf16>, vector<16x8xbf16>, vector<16x8xf32> -> vector<16x8xf32>
    %62 = vector.extract_strided_slice %21 {offsets = [8, 0], sizes = [8, 32], strides = [1, 1]} : vector<32x32xf32> to vector<8x32xf32>
    %63 = arith.truncf %62 : vector<8x32xf32> to vector<8x32xbf16>
    %64 = arith.truncf %61 : vector<16x8xf32> to vector<16x8xbf16>
    %cst_17 = arith.constant dense<0.000000e+00> : vector<16x32xf32>
    %65 = tpu.matmul %64, %63, %cst_17 {dimension_numbers = #tpu.dot_dimension_numbers<[1], [0], [0], [1], [0, 0, 1, 1], [], []>} : vector<16x8xbf16>, vector<8x32xbf16>, vector<16x32xf32> -> vector<16x32xf32>
    %66 = arith.addf %44, %65 : vector<16x32xf32>
    %67 = vector.extract_strided_slice %18 {offsets = [0, 16], sizes = [16, 8], strides = [1, 1]} : vector<16x32xbf16> to vector<16x8xbf16>
    %68 = vector.extract_strided_slice %19 {offsets = [0, 16], sizes = [16, 8], strides = [1, 1]} : vector<16x32xbf16> to vector<16x8xbf16>
    %69 = vector.extract_strided_slice %20 {offsets = [0, 16], sizes = [16, 8], strides = [1, 1]} : vector<16x32xbf16> to vector<16x8xbf16>
    %cst_18 = arith.constant dense<0.000000e+00> : vector<16x16xf32>
    %70 = tpu.matmul %67, %68, %cst_18 {dimension_numbers = #tpu.dot_dimension_numbers<[1], [1], [0], [0], [0, 0, 1, 0], [], []>} : vector<16x8xbf16>, vector<16x8xbf16>, vector<16x16xf32> -> vector<16x16xf32>
    %71 = arith.addf %70, %6 : vector<16x16xf32>
    %cst_19 = arith.constant dense<0xFF800000> : vector<16xf32>
    %72 = vector.multi_reduction <maximumf>, %71, %cst_19 [1] : vector<16x16xf32> to vector<16xf32>
    %73 = vector.shape_cast %72 : vector<16xf32> to vector<16x1xf32>
    %74 = vector.broadcast %73 : vector<16x1xf32> to vector<16x16xf32>
    %75 = arith.subf %71, %74 : vector<16x16xf32>
    %76 = math.exp %75 : vector<16x16xf32>
    %cst_20 = arith.constant dense<0.000000e+00> : vector<16xf32>
    %77 = vector.multi_reduction <add>, %76, %cst_20 [1] : vector<16x16xf32> to vector<16xf32>
    %78 = vector.shape_cast %77 : vector<16xf32> to vector<16x1xf32>
    %79 = tpu.reciprocal %78 {approx = true} : vector<16x1xf32> -> vector<16x1xf32>
    %80 = vector.broadcast %79 : vector<16x1xf32> to vector<16x16xf32>
    %81 = arith.mulf %76, %80 : vector<16x16xf32>
    %82 = arith.truncf %81 : vector<16x16xf32> to vector<16x16xbf16>
    %cst_21 = arith.constant dense<0.000000e+00> : vector<16x8xf32>
    %83 = tpu.matmul %82, %69, %cst_21 {dimension_numbers = #tpu.dot_dimension_numbers<[1], [0], [0], [1], [0, 0, 1, 1], [], []>} : vector<16x16xbf16>, vector<16x8xbf16>, vector<16x8xf32> -> vector<16x8xf32>
    %84 = vector.extract_strided_slice %21 {offsets = [16, 0], sizes = [8, 32], strides = [1, 1]} : vector<32x32xf32> to vector<8x32xf32>
    %85 = arith.truncf %84 : vector<8x32xf32> to vector<8x32xbf16>
    %86 = arith.truncf %83 : vector<16x8xf32> to vector<16x8xbf16>
    %cst_22 = arith.constant dense<0.000000e+00> : vector<16x32xf32>
    %87 = tpu.matmul %86, %85, %cst_22 {dimension_numbers = #tpu.dot_dimension_numbers<[1], [0], [0], [1], [0, 0, 1, 1], [], []>} : vector<16x8xbf16>, vector<8x32xbf16>, vector<16x32xf32> -> vector<16x32xf32>
    %88 = arith.addf %66, %87 : vector<16x32xf32>
    %89 = vector.extract_strided_slice %18 {offsets = [0, 24], sizes = [16, 8], strides = [1, 1]} : vector<16x32xbf16> to vector<16x8xbf16>
    %90 = vector.extract_strided_slice %19 {offsets = [0, 24], sizes = [16, 8], strides = [1, 1]} : vector<16x32xbf16> to vector<16x8xbf16>
    %91 = vector.extract_strided_slice %20 {offsets = [0, 24], sizes = [16, 8], strides = [1, 1]} : vector<16x32xbf16> to vector<16x8xbf16>
    %cst_23 = arith.constant dense<0.000000e+00> : vector<16x16xf32>
    %92 = tpu.matmul %89, %90, %cst_23 {dimension_numbers = #tpu.dot_dimension_numbers<[1], [1], [0], [0], [0, 0, 1, 0], [], []>} : vector<16x8xbf16>, vector<16x8xbf16>, vector<16x16xf32> -> vector<16x16xf32>
    %93 = arith.addf %92, %6 : vector<16x16xf32>
    %cst_24 = arith.constant dense<0xFF800000> : vector<16xf32>
    %94 = vector.multi_reduction <maximumf>, %93, %cst_24 [1] : vector<16x16xf32> to vector<16xf32>
    %95 = vector.shape_cast %94 : vector<16xf32> to vector<16x1xf32>
    %96 = vector.broadcast %95 : vector<16x1xf32> to vector<16x16xf32>
    %97 = arith.subf %93, %96 : vector<16x16xf32>
    %98 = math.exp %97 : vector<16x16xf32>
    %cst_25 = arith.constant dense<0.000000e+00> : vector<16xf32>
    %99 = vector.multi_reduction <add>, %98, %cst_25 [1] : vector<16x16xf32> to vector<16xf32>
    %100 = vector.shape_cast %99 : vector<16xf32> to vector<16x1xf32>
    %101 = tpu.reciprocal %100 {approx = true} : vector<16x1xf32> -> vector<16x1xf32>
    %102 = vector.broadcast %101 : vector<16x1xf32> to vector<16x16xf32>
    %103 = arith.mulf %98, %102 : vector<16x16xf32>
    %104 = arith.truncf %103 : vector<16x16xf32> to vector<16x16xbf16>
    %cst_26 = arith.constant dense<0.000000e+00> : vector<16x8xf32>
    %105 = tpu.matmul %104, %91, %cst_26 {dimension_numbers = #tpu.dot_dimension_numbers<[1], [0], [0], [1], [0, 0, 1, 1], [], []>} : vector<16x16xbf16>, vector<16x8xbf16>, vector<16x8xf32> -> vector<16x8xf32>
    %106 = vector.extract_strided_slice %21 {offsets = [24, 0], sizes = [8, 32], strides = [1, 1]} : vector<32x32xf32> to vector<8x32xf32>
    %107 = arith.truncf %106 : vector<8x32xf32> to vector<8x32xbf16>
    %108 = arith.truncf %105 : vector<16x8xf32> to vector<16x8xbf16>
    %cst_27 = arith.constant dense<0.000000e+00> : vector<16x32xf32>
    %109 = tpu.matmul %108, %107, %cst_27 {dimension_numbers = #tpu.dot_dimension_numbers<[1], [0], [0], [1], [0, 0, 1, 1], [], []>} : vector<16x8xbf16>, vector<8x32xbf16>, vector<16x32xf32> -> vector<16x32xf32>
    %110 = arith.addf %88, %109 : vector<16x32xf32>
    %c0_28 = arith.constant 0 : index
    %c0_29 = arith.constant 0 : index
    %111 = vector.load %arg2[%c0_28, %c0_29] : memref<16x32xf32, #tpu.memory_space<vmem>>, vector<16x32xf32>
    tpu.vector_store %arg2[%c0_28, %c0_29], %110 {strides = array<i32>} : memref<16x32xf32, #tpu.memory_space<vmem>>, vector<16x32xf32>,
    return
  }
}

</mosaic_0001>

<bundles_post_ra>
// kernel: tpu_custom_call.1
= control target key start
LH: loop header
LB: loop body
LE: loop exit
PB: predicated region body
PF: predicated region fallthrough
CT: control target
= control target key end

     0   :  { %v1025_v7 = vmov 0   ;;  %s1026_s27 = smov 96   ;;  %s1027_s28 = smov 64   ;;  %s1241_s0 = inlined_call_operand.vmem [shape: bf16[16,32], index: 0, kind: input, shape index: {}]   ;;  %s1242_s1 = inlined_call_operand.vmem [shape: f32[112,160], index: 1, kind: input, shape index: {}]   ;;  %s1243_s2 = inlined_call_operand.hbm [shape: f32[16,32], index: 2, kind: output, shape index: {}]  }
   0x1   :  { %v20_v0 = vld [vmem:[%s1242_s1 + $0x28] sm:$0xff]  ;;  %v22_v1 = vld [vmem:[%s1242_s1 + $0x38] sm:$0xff]  ;;  %v19_v2 = vld [vmem:[%s1242_s1 + $0x20] sm:$0xff]  ;;  %68 = vmatprep.mubr.bf16.mxu0 %v1025_v7 }
   0x2   :  { %v26_v3 = vpack.c.bf16 %v22_v1, %v20_v0  ;;  %v21_v4 = vld [vmem:[%s1242_s1 + $0x30] sm:$0xff]  ;;  %v16_v5 = vld [vmem:[%s1242_s1 + $0x8] sm:$0xff]  ;;  %v18_v6 = vld [vmem:[%s1242_s1 + $0x18] sm:$0xff] }
   0x3   :  { %v25_v8 = vpack.c.bf16 %v21_v4, %v19_v2  ;;  %v24_v9 = vpack.c.bf16 %v18_v6, %v16_v5  ;;  %v15_v10 = vld [vmem:[%s1242_s1] sm:$0xff]  ;;  %v17_v11 = vld [vmem:[%s1242_s1 + $0x10] sm:$0xff] }
   0x4   :  { %48 = vmatprep.subr.bf16.mxu0 %v26_v3  ;;  %v81_v12 = vld [vmem:[%s1242_s1 + $0xa0] sm:$0xff]  ;;  %v23_v13 = vpack.c.bf16 %v17_v11, %v15_v10  ;;  %v82_v14 = vld [vmem:[%s1242_s1 + $0xb0] sm:$0xff] }
   0x5   :  { %49 = vmatpush1.bf16.msra.mxu0 %v25_v8  ;;  %117 = vrot.lane.b32.xlu0 %v81_v12, %s1026_s27 }
   0x6   :  { %50 = vmatprep.subr.bf16.mxu0 %v24_v9  ;;  %89 = vrot.lane.b32.xlu1 %v81_v12, %s1027_s28 }
   0x7   :  { %7 = vsyncpa [#allocation3], 0  ;;  %v970_v15 = vld [vmem:[%s1241_s0] sm:$0xff]   ;;  %vm32_vm0 = vcmask 261120   ;;  %v80_v17 = vld [vmem:[%s1242_s1 + $0x90] sm:$0xff]  ;;  %s1028_s9 = smov 32  }
   0x8   :  { %v79_v16 = vld [vmem:[%s1242_s1 + $0x80] sm:$0xff]  ;;  %v1029_v18 = vmov 0.0   ;;  %vm1030_vm1 = vmmov 0   ;;  %s1031_s0 = smov 88   ;;  %s1032_s10 = smov 120   ;;  %vm145_vm2 = vcmask 64512  }
   0x9   :  { %51 = vmatpush1.bf16.msra.mxu0 %v23_v13  ;;  %119 = vrot.lane.b32.xlu0 %v82_v14, %s1026_s27  ;;  %v1136_v53 = vld [vmem:[%s1242_s1 + $0xc0] sm:$0xff]  ;;  %vm193_vm3 = vcmask 130048   ;;  %v1142_v57 = vld [vmem:[%s1242_s1 + $0xd0] sm:$0xff]  ;;  %s1033_s15 = smov 80   ;;  %s1034_s16 = smov 112   ;;  %vm391_vm4 = vcmask 1043456  }
   0xa   :  { %91 = vrot.lane.b32.xlu1 %v82_v14, %s1027_s28  ;;  %889 = vmatprep.subr.bf16.mxu0 %v1029_v18  ;;  %s1035_s21 = smov 104   ;;  %s1036_s22 = smov 72  }
   0xb   :  { %883 = vmatprep.subr.bf16.mxu1 %v1029_v18  ;;  %885 = vmatprep.mubr.msk.bf16.mxu1 %vm1030_vm1, %v1029_v18 }
   0xc   :  { %846 = vmatmul.mubr.msk.bf16.vlgmr.msra.gmra.mxu0 %vm32_vm0, %v970_v15 }
   0xd   :  { %109 = vrot.lane.b32.xlu0 %v79_v16, %s1028_s9  ;;  %891 = vmatprep.mubr.msk.bf16.mxu0 %vm1030_vm1, %v1029_v18 }
   0xe   :  { %111 = vrot.lane.b32.xlu1 %v80_v17, %s1028_s9 }
  0x77   :  { %v118_v19 = vpop.permute.xlu0 %117 }
  0x78   :  { %v90_v22 = vpop.permute.xlu1 %89 }
  0x7b   :  { %v120_v24 = vpop.permute.xlu0 %119 }
  0x7c   :  { %v92_v30 = vpop.permute.xlu1 %91 }
  0x7f   :  { %v110_v32 = vpop.permute.xlu0 %109 }
  0x80   :  { %v112_v33 = vpop.permute.xlu1 %111 }
  0xcc   :  { %v70_v20 = vpop.f32.mrf.mxu0 }
  0xcd   :  { %v123_v21 = vmul.f32 %v118_v19, %v70_v20  ;;  %v95_v26 = vmul.f32 %v90_v22, %v70_v20  ;;  %v115_v35 = vmul.f32 %v110_v32, %v70_v20  ;;  %v85_v41 = vmul.f32 %v79_v16, %v70_v20 }
  0xce   :  { %v72_v23 = vpop.f32.mrf.mxu0 }
  0xcf   :  { %127 = vrot.lane.b32.xlu0 %v123_v21, %s1027_s28 }
  0xd0   :  { %v74_v25 = vpop.f32.mrf.mxu0 }
  0xd1   :  { %v124_v27 = vmul.f32 %v120_v24, %v74_v25  ;;  %v96_v31 = vmul.f32 %v92_v30, %v74_v25  ;;  %v116_v36 = vmul.f32 %v112_v33, %v74_v25  ;;  %v86_v43 = vmul.f32 %v80_v17, %v74_v25 }
  0xd2   :  { %v76_v28 = vpop.f32.mrf.mxu0 }
  0xd3   :  { %v1102_v29 = vpack.c.bf16 %v76_v28, %v72_v23  ;;  %99 = vrot.lane.b32.xlu0 %v95_v26, %s1027_s28  ;;  %129 = vrot.lane.b32.xlu1 %v124_v27, %s1027_s28 }
  0xd5   :  { %890 = vmatpush3.bf16.msra.mxu0 %v1102_v29 }
  0xd6   :  { %901 = vmatprep.subr.bf16.mxu0 %v1029_v18 }
  0xd7   :  { %101 = vrot.lane.b32.xlu1 %v96_v31, %s1027_s28 }
 0x141   :  { %v128_v34 = vpop.permute.xlu0 %127 }
 0x142   :  { %v133_v38 = vadd.f32 %v128_v34, %v115_v35 }
 0x145   :  { %v130_v37 = vpop.permute.xlu1 %129  ;;  %v100_v40 = vpop.permute.xlu0 %99 }
 0x146   :  { %v134_v39 = vadd.f32 %v130_v37, %v116_v36  ;;  %v105_v45 = vadd.f32 %v100_v40, %v85_v41 }
 0x148   :  { %v1113_v42 = vpack.c.bf16 %v134_v39, %v133_v38 }
 0x149   :  { %v102_v44 = vpop.permute.xlu1 %101 }
 0x14a   :  { %v106_v46 = vadd.f32 %v102_v44, %v86_v43  ;;  %143 = vrot.lane.b32.xlu0 %v1113_v42, %s1026_s27  ;;  %266 = vrot.lane.b32.xlu1 %v1113_v42, %s1031_s0  ;;  %s1037_s27 = smov [#allocation2]  }
 0x14b   :  { %s834_s28 = sshll.u32 %s1037_s27, 4  ;;  %s835_s28 = int_to_ptr.vmem [resolvable:$true] %s834_s28 }
 0x14c   :  { %v1118_v47 = vpack.c.bf16 %v106_v46, %v105_v45  ;;  %v138_v45 = vld [vmem:[%s1242_s1 + $0x40] sm:$0xff]  ;;  %p1008_p1 = scmp.lt.s32.totalorder %s835_s28, %s835_s28 }
 0x14d   :  { %v261_v46 = vpack.c.bf16 %v138_v45, %v138_v45 }
 0x14e   :  { %264 = vrot.lane.b32.xlu0 %v1118_v47, %s1032_s10 }
 0x1bc   :  { %v144_v48 = vpop.permute.xlu0 %143  ;;  %v267_v50 = vpop.permute.xlu1 %266 }
 0x1bd   :  { %v150_v49 = vsel %vm145_vm2, %v144_v48, 0  ;;  %v272_v51 = vsel %vm145_vm2, %v267_v50, 0  ;;  %v440_v48 = vsel %vm391_vm4, %v261_v46, 0 }
 0x1be   :  { %884 = vmatpush3.bf16.xpose.msra.mxu1 %v150_v49  ;;  %v139_v49 = vld [vmem:[%s1242_s1 + $0x50] sm:$0xff] }
 0x1bf   :  { %895 = vmatprep.subr.bf16.mxu1 %v1029_v18  ;;  %v386_v50 = vpack.c.bf16 %v139_v49, %v139_v49 }
 0x1c0   :  { %v265_v52 = vpop.permute.xlu0 %264 }
 0x1c5   :  { %886 = vmatmul.mubr.msk.bf16.vlgmr.msra.gmra.mxu1 %vm145_vm2, %v1118_v47 }
 0x1c6   :  { %896 = vmatpush3.bf16.xpose.msra.mxu1 %v272_v51  ;;  %897 = vmatprep.mubr.msk.bf16.mxu1 %vm1030_vm1, %v1029_v18  ;;  %v393_v51 = vsel %vm391_vm4, %v386_v50, 0 }
 0x1c7   :  { %907 = vmatprep.subr.bf16.mxu1 %v1029_v18 }
 0x1cd   :  { %898 = vmatmul.mubr.msk.bf16.vlgmr.msra.gmra.mxu1 %vm145_vm2, %v265_v52 }
 0x1ce   :  { %909 = vmatprep.mubr.msk.bf16.mxu1 %vm1030_vm1, %v1029_v18  ;;  %908 = vmatpush3.bf16.msra.mxu1 %v393_v51 }
 0x1cf   :  { %919 = vmatprep.subr.bf16.mxu1 %v1029_v18 }
 0x285   :  { %v186_v54 = vpop.f32.mrf.mxu1 }
 0x286   :  { %v187_v55 = vadd.f32 %v186_v54, %v1136_v53 }
 0x287   :  { %v887_v56 = vpop.f32.mrf.mxu1 }
 0x288   :  { %v194_v58 = vsel %vm193_vm3, %v187_v55, -inf }
 0x289   :  { %195 = vmax.xlane.f32.xlu1 %v194_v58  ;;  %v189_v59 = vpop.f32.mrf.mxu1 }
 0x28a   :  { %v190_v60 = vadd.f32 %v189_v59, %v1142_v57 }
 0x28b   :  { %v888_v61 = vpop.f32.mrf.mxu1 }
 0x28c   :  { %v197_v62 = vsel %vm193_vm3, %v190_v60, -inf }
 0x28d   :  { %198 = vmax.xlane.f32.xlu0 %v197_v62  ;;  %v308_v63 = vpop.f32.mrf.mxu1 }
 0x28e   :  { %v309_v0 = vadd.f32 %v308_v63, %v1136_v53 }
 0x28f   :  { %v899_v1 = vpop.f32.mrf.mxu1 }
 0x290   :  { %v315_v2 = vsel %vm193_vm3, %v309_v0, -inf }
 0x291   :  { %316 = vmax.xlane.f32.xlu0 %v315_v2  ;;  %v311_v3 = vpop.f32.mrf.mxu1 }
 0x292   :  { %v312_v4 = vadd.f32 %v311_v3, %v1142_v57 }
 0x293   :  { %v900_v5 = vpop.f32.mrf.mxu1 }
 0x294   :  { %v318_v6 = vsel %vm193_vm3, %v312_v4, -inf }
 0x295   :  { %319 = vmax.xlane.f32.xlu1 %v318_v6 }
 0x312   :  { %v196_v7 = vpop.xlane.xlu1 %195 }
 0x313   :  { %v200_v8 = vsub.f32 %v187_v55, %v196_v7 }
 0x315   :  { %v202_v9 = vmul.f32 1.442695, %v200_v8 }
 0x316   :  { %v199_v10 = vpop.xlane.xlu0 %198 }
 0x317   :  { %971 = vpow2.f32 %v202_v9  ;;  %v201_v11 = vsub.f32 %v190_v60, %v199_v10 }
 0x319   :  { %v204_v12 = vmul.f32 1.442695, %v201_v11 }
 0x31a   :  { %v317_v13 = vpop.xlane.xlu0 %316 }
 0x31b   :  { %973 = vpow2.f32 %v204_v12  ;;  %v321_v14 = vsub.f32 %v309_v0, %v317_v13 }
 0x31d   :  { %v323_v15 = vmul.f32 1.442695, %v321_v14 }
 0x31e   :  { %v320_v16 = vpop.xlane.xlu1 %319 }
 0x31f   :  { %975 = vpow2.f32 %v323_v15  ;;  %v322_v17 = vsub.f32 %v312_v4, %v320_v16 }
 0x321   :  { %v325_v19 = vmul.f32 1.442695, %v322_v17 }
 0x323   :  { %977 = vpow2.f32 %v325_v19 }
 0x324   :  { %v972_v20 = vpop.eup %971 }
 0x325   :  { %v206_v21 = vsel %vm193_vm3, %v972_v20, 0.0 }
 0x326   :  { %207 = vadd.xlane.f32.xlu0 %v206_v21 }
 0x328   :  { %v974_v22 = vpop.eup %973 }
 0x329   :  { %v209_v23 = vsel %vm193_vm3, %v974_v22, 0.0 }
 0x32a   :  { %210 = vadd.xlane.f32.xlu1 %v209_v23 }
 0x32c   :  { %v976_v24 = vpop.eup %975 }
 0x32d   :  { %v327_v25 = vsel %vm193_vm3, %v976_v24, 0.0 }
 0x32e   :  { %328 = vadd.xlane.f32.xlu0 %v327_v25 }
 0x330   :  { %v978_v26 = vpop.eup %977 }
 0x331   :  { %v330_v27 = vsel %vm193_vm3, %v978_v26, 0.0 }
 0x332   :  { %331 = vadd.xlane.f32.xlu1 %v330_v27 }
 0x343   :  { %485 = vrot.lane.b32.xlu1 %v1113_v42, %s1033_s15 }
 0x344   :  { %339 = vrot.lane.b32.xlu0 %v1102_v29, %s1032_s10 }
 0x347   :  { %483 = vrot.lane.b32.xlu1 %v1118_v47, %s1034_s16 }
 0x3af   :  { %v208_v28 = vpop.xlane.xlu0 %207 }
 0x3b0   :  { %979 = vrcp.f32 %v208_v28 }
 0x3b3   :  { %v211_v30 = vpop.xlane.xlu1 %210 }
 0x3b4   :  { %981 = vrcp.f32 %v211_v30 }
 0x3b7   :  { %v329_v31 = vpop.xlane.xlu0 %328 }
 0x3b8   :  { %983 = vrcp.f32 %v329_v31 }
 0x3bb   :  { %v332_v32 = vpop.xlane.xlu1 %331  ;;  %v340_v38 = vpop.permute.xlu0 %339 }
 0x3bc   :  { %985 = vrcp.f32 %v332_v32 }
 0x3bd   :  { %v980_v33 = vpop.eup %979 }
 0x3be   :  { %v214_v35 = vmul.f32 %v980_v33, %v972_v20 }
 0x3bf   :  { %v486_v61 = vpop.permute.xlu1 %485 }
 0x3c0   :  { %v491_v1 = vsel %vm145_vm2, %v486_v61, 0 }
 0x3c1   :  { %v982_v34 = vpop.eup %981 }
 0x3c2   :  { %v215_v36 = vmul.f32 %v982_v34, %v974_v22 }
 0x3c3   :  { %v484_v2 = vpop.permute.xlu1 %483 }
 0x3c4   :  { %v216_v37 = vpack.c.bf16 %v215_v36, %v214_v35 }
 0x3c5   :  { %v984_v39 = vpop.eup %983 }
 0x3c6   :  { %892 = vmatmul.mubr.msk.bf16.vlgmr.msra.gmra.mxu0 %vm193_vm3, %v216_v37  ;;  %v335_v41 = vmul.f32 %v984_v39, %v976_v24 }
 0x3c7   :  { %902 = vmatpush3.bf16.msra.mxu0 %v340_v38  ;;  %903 = vmatprep.mubr.msk.bf16.mxu0 %vm1030_vm1, %v1029_v18 }
 0x3c8   :  { %913 = vmatprep.subr.bf16.mxu0 %v1029_v18 }
 0x3c9   :  { %v986_v40 = vpop.eup %985 }
 0x3ca   :  { %v336_v43 = vmul.f32 %v986_v40, %v978_v26 }
 0x3cc   :  { %v337_v44 = vpack.c.bf16 %v336_v43, %v335_v41  ;;  %v140_v43 = vld [vmem:[%s1242_s1 + $0x60] sm:$0xff] }
 0x3ce   :  { %904 = vmatmul.mubr.msk.bf16.vlgmr.msra.gmra.mxu0 %vm193_vm3, %v337_v44  ;;  %v604_v44 = vpack.c.bf16 %v140_v43, %v140_v43 }
 0x3cf   :  { %915 = vmatprep.mubr.msk.bf16.mxu0 %vm1030_vm1, %v1029_v18  ;;  %914 = vmatpush3.bf16.msra.mxu0 %v440_v48 }
 0x3d0   :  { %925 = vmatprep.subr.bf16.mxu0 %v1029_v18  ;;  %v610_v45 = vsel %vm391_vm4, %v604_v44, 0 }
 0x486   :  { %v254_v52 = vpop.f32.mrf.mxu0 }
 0x488   :  { %v893_v54 = vpop.f32.mrf.mxu0 }
 0x48a   :  { %v257_v55 = vpop.f32.mrf.mxu0 }
 0x48b   :  { %v262_v56 = vpack.c.bf16 %v257_v55, %v254_v52 }
 0x48c   :  { %v894_v58 = vpop.f32.mrf.mxu0 }
 0x48d   :  { %916 = vmatmul.mubr.msk.bf16.vlgmr.msra.gmra.mxu0 %vm145_vm2, %v262_v56 }
 0x48e   :  { %v379_v59 = vpop.f32.mrf.mxu0  ;;  %927 = vmatprep.mubr.msk.bf16.mxu0 %vm1030_vm1, %v1029_v18 }
 0x490   :  { %v905_v60 = vpop.f32.mrf.mxu0 }
 0x492   :  { %v382_v62 = vpop.f32.mrf.mxu0 }
 0x493   :  { %v387_v63 = vpack.c.bf16 %v382_v62, %v379_v59 }
 0x494   :  { %v906_v0 = vpop.f32.mrf.mxu0 }
 0x495   :  { %910 = vmatmul.mubr.msk.bf16.vlgmr.msra.gmra.mxu1 %vm145_vm2, %v387_v63 }
 0x496   :  { %920 = vmatpush3.bf16.xpose.msra.mxu1 %v491_v1  ;;  %921 = vmatprep.mubr.msk.bf16.mxu1 %vm1030_vm1, %v1029_v18 }
 0x497   :  { %931 = vmatprep.subr.bf16.mxu1 %v1029_v18 }
 0x49d   :  { %922 = vmatmul.mubr.msk.bf16.vlgmr.msra.gmra.mxu1 %vm145_vm2, %v484_v2 }
 0x49e   :  { %933 = vmatprep.mubr.msk.bf16.mxu1 %vm1030_vm1, %v1029_v18  ;;  %932 = vmatpush3.bf16.msra.mxu1 %v610_v45 }
 0x49f   :  { %943 = vmatprep.subr.bf16.mxu1 %v1029_v18 }
 0x54d   :  { %v476_v3 = vpop.f32.mrf.mxu0 }
 0x54f   :  { %v917_v4 = vpop.f32.mrf.mxu0 }
 0x551   :  { %v479_v5 = vpop.f32.mrf.mxu0 }
 0x553   :  { %v918_v6 = vpop.f32.mrf.mxu0 }
 0x555   :  { %v429_v7 = vpop.f32.mrf.mxu1 }
 0x556   :  { %v1188_v8 = vadd.f32 %v476_v3, %v429_v7 }
 0x557   :  { %v911_v9 = vpop.f32.mrf.mxu1 }
 0x559   :  { %v432_v10 = vpop.f32.mrf.mxu1 }
 0x55a   :  { %v1190_v11 = vadd.f32 %v479_v5, %v432_v10 }
 0x55b   :  { %v912_v12 = vpop.f32.mrf.mxu1 }
 0x55d   :  { %v527_v13 = vpop.f32.mrf.mxu1 }
 0x55e   :  { %v528_v14 = vadd.f32 %v527_v13, %v1136_v53 }
 0x55f   :  { %v923_v15 = vpop.f32.mrf.mxu1 }
 0x560   :  { %v534_v16 = vsel %vm193_vm3, %v528_v14, -inf }
 0x561   :  { %535 = vmax.xlane.f32.xlu0 %v534_v16  ;;  %v530_v17 = vpop.f32.mrf.mxu1 }
 0x562   :  { %v531_v19 = vadd.f32 %v530_v17, %v1142_v57 }
 0x563   :  { %v924_v20 = vpop.f32.mrf.mxu1 }
 0x564   :  { %v537_v21 = vsel %vm193_vm3, %v531_v19, -inf }
 0x565   :  { %538 = vmax.xlane.f32.xlu1 %v537_v21 }
 0x576   :  { %557 = vrot.lane.b32.xlu1 %v1102_v29, %s1034_s16 }
 0x57a   :  { %655 = vrot.lane.b32.xlu1 %v1118_v47, %s1035_s21 }
 0x5ea   :  { %v536_v22 = vpop.xlane.xlu0 %535 }
 0x5eb   :  { %v540_v23 = vsub.f32 %v528_v14, %v536_v22 }
 0x5ed   :  { %v542_v24 = vmul.f32 1.442695, %v540_v23 }
 0x5ee   :  { %v539_v25 = vpop.xlane.xlu1 %538 }
 0x5ef   :  { %987 = vpow2.f32 %v542_v24  ;;  %v541_v26 = vsub.f32 %v531_v19, %v539_v25 }
 0x5f1   :  { %v544_v27 = vmul.f32 1.442695, %v541_v26 }
 0x5f2   :  { %v558_v28 = vpop.permute.xlu1 %557 }
 0x5f3   :  { %989 = vpow2.f32 %v544_v27  ;;  %926 = vmatpush3.bf16.msra.mxu0 %v558_v28 }
 0x5f4   :  { %937 = vmatprep.subr.bf16.mxu0 %v1029_v18 }
 0x5fc   :  { %v988_v30 = vpop.eup %987 }
 0x5fd   :  { %v546_v31 = vsel %vm193_vm3, %v988_v30, 0.0 }
 0x5fe   :  { %547 = vadd.xlane.f32.xlu0 %v546_v31 }
 0x600   :  { %v990_v32 = vpop.eup %989 }
 0x601   :  { %v549_v33 = vsel %vm193_vm3, %v990_v32, 0.0 }
 0x602   :  { %550 = vadd.xlane.f32.xlu0 %v549_v33 }
 0x618   :  { %657 = vrot.lane.b32.xlu0 %v1113_v42, %s1036_s22  ;;  %v656_v42 = vpop.permute.xlu1 %655 }
 0x687   :  { %v548_v47 = vpop.xlane.xlu0 %547 }
 0x688   :  { %991 = vrcp.f32 %v548_v47 }
 0x68b   :  { %v551_v34 = vpop.xlane.xlu0 %550 }
 0x68c   :  { %993 = vrcp.f32 %v551_v34 }
 0x68f   :  { %v658_v39 = vpop.permute.xlu0 %657 }
 0x690   :  { %v663_v41 = vsel %vm145_vm2, %v658_v39, 0 }
 0x695   :  { %v992_v35 = vpop.eup %991 }
 0x696   :  { %v554_v37 = vmul.f32 %v992_v35, %v988_v30 }
 0x699   :  { %v994_v36 = vpop.eup %993 }
 0x69a   :  { %v555_v38 = vmul.f32 %v994_v36, %v990_v32 }
 0x69c   :  { %v556_v40 = vpack.c.bf16 %v555_v38, %v554_v37 }
 0x69e   :  { %928 = vmatmul.mubr.msk.bf16.vlgmr.msra.gmra.mxu0 %vm193_vm3, %v556_v40 }
 0x69f   :  { %938 = vmatpush3.bf16.xpose.msra.mxu0 %v663_v41  ;;  %939 = vmatprep.mubr.msk.bf16.mxu0 %vm1030_vm1, %v1029_v18 }
 0x6a0   :  { %949 = vmatprep.subr.bf16.mxu0 %v1029_v18 }
 0x6a6   :  { %940 = vmatmul.mubr.msk.bf16.vlgmr.msra.gmra.mxu0 %vm145_vm2, %v656_v42 }
 0x6a7   :  { %951 = vmatprep.mubr.msk.bf16.mxu0 %vm1030_vm1, %v1029_v18 }
 0x75e   :  { %v597_v46 = vpop.f32.mrf.mxu0 }
 0x760   :  { %v929_v48 = vpop.f32.mrf.mxu0 }
 0x762   :  { %v600_v49 = vpop.f32.mrf.mxu0 }
 0x763   :  { %v605_v50 = vpack.c.bf16 %v600_v49, %v597_v46 }
 0x764   :  { %v930_v51 = vpop.f32.mrf.mxu0 }
 0x765   :  { %934 = vmatmul.mubr.msk.bf16.vlgmr.msra.gmra.mxu1 %vm145_vm2, %v605_v50 }
 0x766   :  { %v699_v52 = vpop.f32.mrf.mxu0  ;;  %945 = vmatprep.mubr.msk.bf16.mxu1 %vm1030_vm1, %v1029_v18 }
 0x767   :  { %v700_v54 = vadd.f32 %v699_v52, %v1136_v53 }
 0x768   :  { %v941_v55 = vpop.f32.mrf.mxu0 }
 0x769   :  { %v706_v56 = vsel %vm193_vm3, %v700_v54, -inf }
 0x76a   :  { %707 = vmax.xlane.f32.xlu1 %v706_v56  ;;  %v702_v58 = vpop.f32.mrf.mxu0 }
 0x76b   :  { %v703_v59 = vadd.f32 %v702_v58, %v1142_v57 }
 0x76c   :  { %v942_v60 = vpop.f32.mrf.mxu0 }
 0x76d   :  { %v709_v61 = vsel %vm193_vm3, %v703_v59, -inf }
 0x76e   :  { %710 = vmax.xlane.f32.xlu0 %v709_v61 }
 0x7f3   :  { %v708_v62 = vpop.xlane.xlu1 %707 }
 0x7f4   :  { %v712_v63 = vsub.f32 %v700_v54, %v708_v62 }
 0x7f6   :  { %v714_v0 = vmul.f32 1.442695, %v712_v63 }
 0x7f7   :  { %v711_v1 = vpop.xlane.xlu0 %710 }
 0x7f8   :  { %995 = vpow2.f32 %v714_v0  ;;  %v713_v2 = vsub.f32 %v703_v59, %v711_v1 }
 0x7fa   :  { %v716_v18 = vmul.f32 1.442695, %v713_v2 }
 0x7fc   :  { %997 = vpow2.f32 %v716_v18 }
 0x805   :  { %v996_v53 = vpop.eup %995 }
 0x806   :  { %v718_v3 = vsel %vm193_vm3, %v996_v53, 0.0 }
 0x807   :  { %719 = vadd.xlane.f32.xlu0 %v718_v3 }
 0x809   :  { %v998_v4 = vpop.eup %997 }
 0x80a   :  { %v721_v5 = vsel %vm193_vm3, %v998_v4, 0.0 }
 0x80b   :  { %722 = vadd.xlane.f32.xlu1 %v721_v5 }
 0x81d   :  { %729 = vrot.lane.b32.xlu0 %v1102_v29, %s1035_s21  ;;  %v141_v29 = vld [vmem:[%s1242_s1 + $0x70] sm:$0xff]  ;;  %s1003_s1 = scalar_lea.vmem %s835_s28, 256 }
 0x81e   :  { %p1004_p0 = scmp.ne.s32.totalorder %s835_s28, %s1003_s1  ;;  %p1009_p2 = scmp.lt.s32.totalorder %s1003_s1, %s1003_s1 }
 0x820   :  { %p1010_p3 = por %p1009_p2, %p1008_p1 }
 0x822   :  { %p1011_p4 = pnand %p1010_p3, %p1004_p0 }
 0x825   :  { %v646_v57 = vpop.f32.mrf.mxu1 }
 0x826   :  { %v653_v6 = vadd.f32 %v646_v57, %v1188_v8  ;;  %v776_v8 = vpack.c.bf16 %v141_v29, %v141_v29 }
 0x827   :  { %v935_v7 = vpop.f32.mrf.mxu1 }
 0x829   :  { %v649_v9 = vpop.f32.mrf.mxu1 }
 0x82a   :  { %v654_v10 = vadd.f32 %v649_v9, %v1190_v11  ;;  %v782_v11 = vsel %vm391_vm4, %v776_v8, 0 }
 0x82b   :  { %v936_v12 = vpop.f32.mrf.mxu1  ;;  %950 = vmatpush3.bf16.msra.mxu0 %v782_v11 }
 0x890   :  { %v720_v13 = vpop.xlane.xlu0 %719 }
 0x891   :  { %999 = vrcp.f32 %v720_v13 }
 0x894   :  { %v723_v14 = vpop.xlane.xlu1 %722  ;;  %v730_v15 = vpop.permute.xlu0 %729 }
 0x895   :  { %1001 = vrcp.f32 %v723_v14  ;;  %944 = vmatpush3.bf16.msra.mxu1 %v730_v15 }
 0x89e   :  { %v1000_v16 = vpop.eup %999 }
 0x89f   :  { %v726_v20 = vmul.f32 %v1000_v16, %v996_v53 }
 0x8a2   :  { %v1002_v17 = vpop.eup %1001 }
 0x8a3   :  { %v727_v19 = vmul.f32 %v1002_v17, %v998_v4 }
 0x8a5   :  { %v728_v21 = vpack.c.bf16 %v727_v19, %v726_v20 }
 0x8a7   :  { %946 = vmatmul.mubr.msk.bf16.vlgmr.msra.gmra.mxu1 %vm193_vm3, %v728_v21 }
 0x967   :  { %v769_v22 = vpop.f32.mrf.mxu1 }
 0x969   :  { %v947_v23 = vpop.f32.mrf.mxu1 }
 0x96b   :  { %v772_v24 = vpop.f32.mrf.mxu1 }
 0x96c   :  { %v777_v25 = vpack.c.bf16 %v772_v24, %v769_v22 }
 0x96d   :  { %v948_v26 = vpop.f32.mrf.mxu1 }
 0x96e   :  { %952 = vmatmul.mubr.msk.bf16.vlgmr.msra.gmra.mxu0 %vm145_vm2, %v777_v25 }
 0xa2e   :  { %v818_v27 = vpop.f32.mrf.mxu0 }
 0xa2f   :  { %v825_v28 = vadd.f32 %v818_v27, %v653_v6 }
 0xa30   :  { %v953_v30 = vpop.f32.mrf.mxu0 }
 0xa31   :  { %827 = vst.msk [vmem:[#allocation2] sm:$0xff] %vm32_vm0, %v825_v28 }
 0xa32   :  { %v821_v31 = vpop.f32.mrf.mxu0 }
 0xa33   :  { %v826_v32 = vadd.f32 %v821_v31, %v654_v10 }
 0xa34   :  { %v954_v33 = vpop.f32.mrf.mxu0 }
 0xa35   :  { %828 = vst.msk [vmem:[#allocation2 + $0x8] sm:$0xff] %vm32_vm0, %v826_v32 }
 0xa36   :  { %1014 = shalt.err (!%p1011_p4)
}
 0xa37   :  { %s1038_s29 = smov 128   ;;  %s1039_s30 = smov 8  }
 0xa38   :  { %840 = dma.vmem_to_hbm [thread:$0]  %s835_s28, 256, %s1243_s2, [#allocation3], %s1038_s29, %s1038_s29, %s1039_s30  }
 0xa39   :  { %1023 = dma.done.wait [#allocation3], 256  }
 0xa3a   :  { %1024 = vsyncadd [#allocation3], 4294967040 }
 0xa3b   :  { %844 = vsyncpa [#allocation3], 1 }

</bundles_post_ra>
